<compile_context>
chip_gen: v5e
topology: v5e:2x2
jax: 0.10.0
libtpu: 0.0.40
codegen_flags: <defaults>
</compile_context>

<pallas_src>
import functools

import jax
import jax.numpy as jnp
import numpy as np
from jax.experimental import pallas as pl
from jax.experimental.pallas import tpu as pltpu


def crop_shift_kernel(params_ref, row_ref, col_ref, x_ref, o_ref, *, h, w):
    # params (int32, SMEM via scalar prefetch): [dy, dx, r0, r1, c0, c1]
    dy = params_ref[0]
    dx = params_ref[1]
    r0 = params_ref[2]
    r1 = params_ref[3]
    c0 = params_ref[4]
    c1 = params_ref[5]

    hw = h * w

    # For every in-bounds output pixel (i, j) with flat index f = i*w + j the
    # source is img[i + dy, j + dx], i.e. flat index f + (dy*w + dx), which
    # stays inside [0, hw) on the valid rectangle.  So a single lane-axis roll
    # of the flattened plane is exact; any wrap-around only lands in positions
    # the mask zeroes anyway.  |dy*w + dx| < hw, so no modulo is needed.
    off = dy * w + dx
    shift = jnp.where(off > 0, hw - off, -off)          # roll amount in [0, hw)
    rolled = pltpu.roll(x_ref[...], shift, axis=1)      # XLU, native dtype

    # Rectangle mask from precomputed per-pixel (row, col) indices of the
    # flattened lane axis (shape (1, hw), broadcast over the plane batch).
    row = row_ref[...]
    col = col_ref[...]
    keep = (row >= r0) & (row < r1) & (col >= c0) & (col < c1)
    o_ref[...] = jnp.where(keep, rolled, jnp.zeros_like(rolled))


def _planes_per_block(nc, hw, itemsize):
    """Planes (sublanes) per grid step.

    Block leading dim must be a multiple of 8 or equal the full extent; the
    double-buffered in+out tiles are budgeted against a conservative 16 MiB so
    they fit v7x's smaller (~32 MiB scoped / 64 MiB physical) VMEM; and when
    possible we leave >= 2 grid steps so dimension_semantics=("parallel",)
    can shard across v7x's two TensorCores.
    """
    budget = 16 * 1024 * 1024
    max_b = max(1, budget // (4 * hw * itemsize))       # 2 buffers x (in + out)
    if nc <= 8:
        return nc                                       # full-extent block
    divs = [b for b in range(8, nc + 1, 8) if nc % b == 0 and b <= max_b]
    if not divs:
        return nc                                       # single full block
    multi = [b for b in divs if nc // b >= 2]
    return max(multi) if multi else max(divs)


def crop_shift_pallas(img, params):
    """img: (N, C, H, W); params: int32[6] = [dy, dx, r0, r1, c0, c1]."""
    N, C, H, W = img.shape
    nc, hw = N * C, H * W
    itemsize = jnp.dtype(img.dtype).itemsize

    # Free (contiguous) reshape: planes on sublanes, flattened pixels on lanes.
    x = img.reshape(nc, hw)

    # Static per-pixel (row, col) indices of the flattened lane axis, passed as
    # tiny inputs (same block every step -> fetched once, no per-step iota/div).
    flat = np.arange(hw, dtype=np.int32)
    row_ids = jnp.asarray((flat // W).reshape(1, hw))
    col_ids = jnp.asarray((flat % W).reshape(1, hw))

    bp = _planes_per_block(nc, hw, itemsize)
    grid = (pl.cdiv(nc, bp),)

    kernel = functools.partial(crop_shift_kernel, h=H, w=W)
    out = pl.pallas_call(
        kernel,
        out_shape=jax.ShapeDtypeStruct((nc, hw), img.dtype),
        grid_spec=pltpu.PrefetchScalarGridSpec(
            num_scalar_prefetch=1,
            grid=grid,
            in_specs=[
                pl.BlockSpec((1, hw), lambda i, p: (0, 0)),    # row_ids
                pl.BlockSpec((1, hw), lambda i, p: (0, 0)),    # col_ids
                pl.BlockSpec((bp, hw), lambda i, p: (i, 0)),   # image planes
            ],
            out_specs=pl.BlockSpec((bp, hw), lambda i, p: (i, 0)),
        ),
        compiler_params=pltpu.CompilerParams(
            dimension_semantics=("parallel",)),
        cost_estimate=pl.CostEstimate(
            flops=0, transcendentals=0,
            bytes_accessed=2 * nc * hw * itemsize + 2 * hw * 4),
    )(params, row_ids, col_ids, x)
    return out.reshape(N, C, H, W)


def sample_crop_shift_params(key, h, w, low, high):
    """Host-side equivalent of CropShift's torch.randint(...).item() calls."""
    # TODO(synk): host-side scalar RNG (.item() in the PyTorch module) has no
    # in-kernel equivalent; it stays as wrapper glue.
    def ri(k, lo, hi):  # randint in [lo, hi)
        return int(jax.random.randint(k, (), lo, hi))

    ks = jax.random.split(key, 6)
    strength = low if low == high else ri(ks[0], low, high)
    crop_x = ri(ks[1], 0, strength + 1)
    crop_y = strength - crop_x
    crop_w, crop_h = w - crop_x, h - crop_y
    top_x1 = ri(ks[2], 0, crop_x + 1)
    top_y1 = ri(ks[3], 0, crop_y + 1)
    top_x2 = ri(ks[4], 0, crop_x + 1)
    top_y2 = ri(ks[5], 0, crop_y + 1)

    # crop(top_y1, top_x1, crop_h, crop_w) -> pad([crop_x, crop_y], 0)
    #   -> crop(top_y2, top_x2, h, w)  collapses to a masked shifted copy:
    dy = top_y2 - crop_y + top_y1
    dx = top_x2 - crop_x + top_x1
    r0, r1 = crop_y - top_y2, h - top_y2
    c0, c1 = crop_x - top_x2, w - top_x2
    params = jnp.array([dy, dx, r0, r1, c0, c1], dtype=jnp.int32)
    return params, (dy, dx, r0, r1, c0, c1)


if __name__ == "__main__":
    N, C, H, W = 2, 4, 16, 16
    low, high = 3, 6

    key = jax.random.PRNGKey(0)
    k_img, k_rand = jax.random.split(key)
    img = jax.random.normal(k_img, (N, C, H, W), dtype=jnp.float32)

    params, (dy, dx, r0, r1, c0, c1) = sample_crop_shift_params(
        k_rand, H, W, low, high)

    out = crop_shift_pallas(img, params)
    out = jax.block_until_ready(out)

    # Pure-numpy reference of the collapsed crop->pad->crop (bit-exact).
    x_np = np.asarray(img)
    ref = np.zeros_like(x_np)
    ref[:, :, r0:r1, c0:c1] = x_np[:, :, r0 + dy:r1 + dy, c0 + dx:c1 + dx]
    np.testing.assert_allclose(np.asarray(out), ref, rtol=0, atol=0)

    print("KERNEL_OK")
</pallas_src>

<mosaic_0001>
module attributes {stable_mosaic.version = 11 : i64} {
  func.func @crop_shift_kernel(%arg0: i32, %arg1: memref<6xi32, #tpu.memory_space<smem>>, %arg2: memref<1x256xi32, #tpu.memory_space<vmem>>, %arg3: memref<1x256xi32, #tpu.memory_space<vmem>>, %arg4: memref<8x256xf32, #tpu.memory_space<vmem>>, %arg5: memref<8x256xf32, #tpu.memory_space<vmem>>) attributes {dimension_semantics = [#tpu.dimension_semantics<parallel>], iteration_bounds = array<i64: 1>, scalar_prefetch = 1 : i64, scratch_operands = 0 : i64, tpu.core_type = #tpu.core_type<tc>, window_params = [{pipeline_mode = #tpu.pipeline_mode<synchronous>, transform_indices = @transform_0, window_bounds = array<i64: 1, 256>}, {pipeline_mode = #tpu.pipeline_mode<synchronous>, transform_indices = @transform_1, window_bounds = array<i64: 1, 256>}, {transform_indices = @transform_2, window_bounds = array<i64: 8, 256>}, {transform_indices = @transform_3, window_bounds = array<i64: 8, 256>}]} {
    %c0 = arith.constant 0 : index
    %0 = memref.load %arg1[%c0] : memref<6xi32, #tpu.memory_space<smem>>
    %c1 = arith.constant 1 : index
    %1 = memref.load %arg1[%c1] : memref<6xi32, #tpu.memory_space<smem>>
    %c2 = arith.constant 2 : index
    %2 = memref.load %arg1[%c2] : memref<6xi32, #tpu.memory_space<smem>>
    %c3 = arith.constant 3 : index
    %3 = memref.load %arg1[%c3] : memref<6xi32, #tpu.memory_space<smem>>
    %c4 = arith.constant 4 : index
    %4 = memref.load %arg1[%c4] : memref<6xi32, #tpu.memory_space<smem>>
    %c5 = arith.constant 5 : index
    %5 = memref.load %arg1[%c5] : memref<6xi32, #tpu.memory_space<smem>>
    %c16_i32 = arith.constant 16 : i32
    %6 = arith.muli %0, %c16_i32 : i32
    %7 = arith.addi %6, %1 : i32
    %c0_i32 = arith.constant 0 : i32
    %8 = arith.cmpi sgt, %7, %c0_i32 : i32
    %c256_i32 = arith.constant 256 : i32
    %9 = arith.subi %c256_i32, %7 : i32
    %c0_i32_0 = arith.constant 0 : i32
    %10 = arith.subi %c0_i32_0, %7 : i32
    %11 = arith.select %8, %9, %10 : i32
    %c0_1 = arith.constant 0 : index
    %c0_2 = arith.constant 0 : index
    %12 = vector.load %arg4[%c0_1, %c0_2] : memref<8x256xf32, #tpu.memory_space<vmem>>, vector<8x256xf32>
    %13 = tpu.dynamic_rotate %12 by %11 dim 1 : vector<8x256xf32>, i32 -> vector<8x256xf32>
    %c0_3 = arith.constant 0 : index
    %c0_4 = arith.constant 0 : index
    %14 = vector.load %arg2[%c0_3, %c0_4] : memref<1x256xi32, #tpu.memory_space<vmem>>, vector<1x256xi32>
    %c0_5 = arith.constant 0 : index
    %c0_6 = arith.constant 0 : index
    %15 = vector.load %arg3[%c0_5, %c0_6] : memref<1x256xi32, #tpu.memory_space<vmem>>, vector<1x256xi32>
    %16 = vector.broadcast %2 : i32 to vector<1x256xi32>
    %17 = arith.cmpi sge, %14, %16 : vector<1x256xi32>
    %18 = vector.broadcast %3 : i32 to vector<1x256xi32>
    %19 = arith.cmpi slt, %14, %18 : vector<1x256xi32>
    %20 = arith.andi %17, %19 : vector<1x256xi1>
    %21 = vector.broadcast %4 : i32 to vector<1x256xi32>
    %22 = arith.cmpi sge, %15, %21 : vector<1x256xi32>
    %23 = arith.andi %20, %22 : vector<1x256xi1>
    %24 = vector.broadcast %5 : i32 to vector<1x256xi32>
    %25 = arith.cmpi slt, %15, %24 : vector<1x256xi32>
    %26 = arith.andi %23, %25 : vector<1x256xi1>
    %cst = arith.constant 0.000000e+00 : f32
    %27 = vector.broadcast %cst : f32 to vector<8x256xf32>
    %28 = vector.shape_cast %26 : vector<1x256xi1> to vector<1x256xi1>
    %29 = vector.broadcast %28 : vector<1x256xi1> to vector<8x256xi1>
    %30 = arith.select %29, %13, %27 : vector<8x256xi1>, vector<8x256xf32>
    %c0_7 = arith.constant 0 : index
    %c0_8 = arith.constant 0 : index
    %31 = vector.load %arg5[%c0_7, %c0_8] : memref<8x256xf32, #tpu.memory_space<vmem>>, vector<8x256xf32>
    tpu.vector_store %arg5[%c0_7, %c0_8], %30 {strides = array<i32>} : memref<8x256xf32, #tpu.memory_space<vmem>>, vector<8x256xf32>,
    return
  }
  func.func @transform_0(%arg0: i32, %arg1: memref<6xi32, #tpu.memory_space<smem>>) -> (i32, i32) {
    %c0_i32 = arith.constant 0 : i32
    %c0_i32_0 = arith.constant 0 : i32
    %c0_i32_1 = arith.constant 0 : i32
    return %c0_i32, %c0_i32_0 : i32, i32
  }
  func.func @transform_1(%arg0: i32, %arg1: memref<6xi32, #tpu.memory_space<smem>>) -> (i32, i32) {
    %c0_i32 = arith.constant 0 : i32
    %c0_i32_0 = arith.constant 0 : i32
    %c0_i32_1 = arith.constant 0 : i32
    return %c0_i32, %c0_i32_0 : i32, i32
  }
  func.func @transform_2(%arg0: i32, %arg1: memref<6xi32, #tpu.memory_space<smem>>) -> (i32, i32) {
    %c0_i32 = arith.constant 0 : i32
    %c0_i32_0 = arith.constant 0 : i32
    return %arg0, %c0_i32 : i32, i32
  }
  func.func @transform_3(%arg0: i32, %arg1: memref<6xi32, #tpu.memory_space<smem>>) -> (i32, i32) {
    %c0_i32 = arith.constant 0 : i32
    %c0_i32_0 = arith.constant 0 : i32
    return %arg0, %c0_i32 : i32, i32
  }
}

</mosaic_0001>

<bundles_post_ra>
// kernel: tpu_custom_call.1
= control target key start
LH: loop header
LB: loop body
LE: loop exit
PB: predicated region body
PF: predicated region fallthrough
CT: control target
= control target key end

     0   :  { %s265_s18 = smov [#allocation3]   ;;  %s316_s0 = inlined_call_operand.hbm [shape: s32[6], index: 0, kind: input, shape index: {}]   ;;  %s317_s1 = inlined_call_operand.hbm [shape: s32[1,256], index: 1, kind: input, shape index: {}]   ;;  %s318_s2 = inlined_call_operand.hbm [shape: s32[1,256], index: 2, kind: input, shape index: {}]   ;;  %s319_s3 = inlined_call_operand.hbm [shape: f32[8,256], index: 3, kind: input, shape index: {}]   ;;  %s320_s4 = inlined_call_operand.hbm [shape: f32[8,256], index: 4, kind: output, shape index: {}]  }
   0x1   :  { %s10_s17 = sshll.u32 %s316_s0, 4  ;;  %s11_s17 = int_to_ptr.hbm [resolvable:$true] %s10_s17 }
   0x2   :  { %13 = dma.hbm_to_smem %s11_s17, 16, %s265_s18, [#allocation2] }
   0x3   :  { %257 = dma.done.wait [#allocation2], 16 }
   0x4   :  { %258 = vsyncadd [#allocation2], 4294967280 }
   0x5   :  { %16 = sfence }
   0x6   :  { %17 = vsyncpa [#allocation5], 0 }
   0x7   :  { %18 = vsyncpa [#allocation8], 0  ;;  %s36_s21 = sshll.u32 %s318_s2, 4  ;;  %s37_s21 = int_to_ptr.hbm [resolvable:$true] %s36_s21 }
   0x8   :  { %19 = vsyncpa [#allocation6], 0  ;;  %s266_s22 = smov [#allocation7]   ;;  %s25_s0 = sshll.u32 %s317_s1, 4  ;;  %s26_s0 = int_to_ptr.hbm [resolvable:$true] %s25_s0 }
   0x9   :  { %s38_s23 = sshll.u32 %s266_s22, 4  ;;  %s267_s26 = smov [#allocation4]   ;;  %s39_s23 = int_to_ptr.vmem [resolvable:$true] %s38_s23 }
   0xa   :  { %41 = dma.hbm_to_vmem [thread:$0]  %s37_s21, 32, %s39_s23, [#allocation8]  }
   0xb   :  { %s27_s27 = sshll.u32 %s267_s26, 4  ;;  %s47_s30 = sshll.u32 %s319_s3, 4  ;;  %s28_s27 = int_to_ptr.vmem [resolvable:$true] %s27_s27  ;;  %s48_s30 = int_to_ptr.hbm [resolvable:$true] %s47_s30 }
   0xc   :  { %30 = dma.hbm_to_vmem [thread:$0]  %s26_s0, 32, %s28_s27, [#allocation5]  }
   0xd   :  { %s268_s2 = smov [#allocation9]  }
   0xe   :  { %s49_s5 = sshll.u32 %s268_s2, 4  ;;  %s50_s5 = int_to_ptr.vmem [resolvable:$true] %s49_s5 }
   0xf   :  { %52 = dma.hbm_to_vmem [thread:$0]  %s48_s30, 256, %s50_s5, [#allocation8]  }
  0x10   :  { %259 = dma.done.wait [#allocation5], 32  }
  0x11   :  { %260 = vsyncadd [#allocation5], 4294967264 }
  0x12   :  { %261 = dma.done.wait [#allocation8], 288  }
  0x13   :  { %262 = vsyncadd [#allocation8], 4294967008  ;;  %s65_s1 = sld [smem:[#allocation3]]  ;;  %v77_v0 = vld [vmem:[#allocation9] sm:$0xff]  ;;  %v78_v1 = vld [vmem:[#allocation9 + $0x8] sm:$0xff]  ;;  %v87_v8 = vlaneseq  ;;  %v269_v10 = vmov 0  }
  0x14   :  { %s137_s6 = sld [smem:[#allocation3 + $0x1]]  ;;  %v97_v2 = vld [vmem:[#allocation4] sm:$0x3]  ;;  %v98_v5 = vld [vmem:[#allocation7] sm:$0x3]  ;;  %s270_s18 = smov [#allocation10]  }
  0x15   :  { %s138_s12 = sld [smem:[#allocation3 + $0x2]]  ;;  %v88_v12 = vand.u32 127, %v87_v8  ;;  %s124_s19 = sshll.u32 %s270_s18, 4  ;;  %s125_s19 = int_to_ptr.vmem [resolvable:$true] %s124_s19 }
  0x16   :  { %s139_s13 = sld [smem:[#allocation3 + $0x3]]  ;;  %s126_s22 = sshll.u32 %s320_s4, 4  ;;  %s127_s22 = int_to_ptr.hbm [resolvable:$true] %s126_s22 }
  0x17   :  { %s140_s14 = sld [smem:[#allocation3 + $0x4]] }
  0x18   :  { %s141_s15 = sld [smem:[#allocation3 + $0x5]] }
  0x19   :  { %s142_s7 = sshll.u32 %s65_s1, 4 }
  0x1a   :  { %s72_s8 = sadd.s32 %s142_s7, %s137_s6 }
  0x1b   :  { %p73_p0 = scmp.gt.s32.totalorder %s72_s8, 0  ;;  %s74_s9 = ssub.s32 256, %s72_s8  ;;  %v99_v3 = vstv %s138_s12 }
  0x1c   :  { %s75_s10 = ssub.s32 0, %s72_s8  ;;  %v101_v4 = vstv %s139_s13  ;;  %vm100_vm0 = vcmp.ge.s32.totalorder %v97_v2, %v99_v3 }
  0x1d   :  { %s322_s9 = smov (!%p73_p0, %s74_s9), %s75_s10  ;;  %vm102_vm1 = vcmp.lt.s32.totalorder %v97_v2, %v101_v4  ;;  %v104_v6 = vstv %s140_s14 }
  0x1e   :  { %s79_s3 = sand.u32 255, %s322_s9   ;;  %vm103_vm2 = vmand %vm100_vm0, %vm102_vm1  ;;  %vm105_vm3 = vcmp.ge.s32.totalorder %v98_v5, %v104_v6  ;;  %v107_v7 = vstv %s141_s15 }
  0x1f   :  { %s308_s11 = sand.u32 127, %s79_s3   ;;  %vm106_vm4 = vmand %vm103_vm2, %vm105_vm3  ;;  %vm108_vm5 = vcmp.lt.s32.totalorder %v98_v5, %v107_v7  ;;  %s81_s16 = sshrl.u32 %s79_s3, 7 }
  0x20   :  { %82 = vrot.lane.b32.xlu0 %v77_v0, %s308_s11  ;;  %vm109_vm6 = vmand %vm106_vm4, %vm108_vm5  ;;  %s92_s17 = sand.u32 1, %s81_s16  ;;  %v86_v13 = vstv %s308_s11 }
  0x21   :  { %v110_v11 = vsel %vm109_vm6, 1, %v269_v10  ;;  %v93_v14 = vstv %s92_s17  ;;  %vm89_vm7 = vcmp.lt.s32.totalorder %v88_v12, %v86_v13 }
  0x22   :  { %v111_v15 = vperm.slane %v110_v11, 0  ;;  %v112_v16 = vperm.slane %v110_v11, 1  ;;  %vm94_vm8 = vcmp.ne.s32.totalorder %v93_v14, 0 }
  0x24   :  { %vm113_vm9 = vcmp.eq.s32.totalorder %v111_v15, 1  ;;  %vm114_vm10 = vcmp.eq.s32.totalorder %v112_v16, 1 }
  0x28   :  { %84 = vrot.lane.b32.xlu0 %v78_v1, %s308_s11 }
  0x92   :  { %v83_v9 = vpop.permute.xlu0 %82 }
  0x9a   :  { %v85_v17 = vpop.permute.xlu0 %84 }
  0x9b   :  { %v90_v18 = vsel %vm89_vm7, %v83_v9, %v85_v17  ;;  %v91_v19 = vsel %vm89_vm7, %v85_v17, %v83_v9 }
  0x9c   :  { %v95_v20 = vsel %vm94_vm8, %v90_v18, %v91_v19  ;;  %v96_v21 = vsel %vm94_vm8, %v91_v19, %v90_v18 }
  0x9d   :  { %v115_v22 = vsel %vm113_vm9, %v95_v20, 0.0  ;;  %v116_v23 = vsel %vm114_vm10, %v96_v21, 0.0 }
  0x9e   :  { %117 = vst [vmem:[#allocation10] sm:$0xff] %v115_v22 }
  0x9f   :  { %118 = vst [vmem:[#allocation10 + $0x8] sm:$0xff] %v116_v23 }
  0xa0   :  { %129 = dma.vmem_to_hbm [thread:$0]  %s125_s19, 256, %s127_s22, [#allocation6]  }
  0xa1   :  { %263 = dma.done.wait [#allocation6], 256  }
  0xa2   :  { %264 = vsyncadd [#allocation6], 4294967040 }
  0xa3   :  { %134 = vsyncpa [#allocation5], 1 }
  0xa4   :  { %135 = vsyncpa [#allocation8], 1 }
  0xa5   :  { %136 = vsyncpa [#allocation6], 1 }

</bundles_post_ra>
